<compile_context>
chip_gen: v7x
topology: tpu7x:2x2x1
jax: 0.10.0
libtpu: 0.0.40
codegen_flags: <defaults>
</compile_context>

<pallas_src>
import functools
import math

import jax
import jax.numpy as jnp
from jax import lax
from jax.experimental import pallas as pl
from jax.experimental.pallas import tpu as pltpu


# --------------------------------------------------------------------------- kernels

def _linear_kernel(x_ref, w_ref, b_ref, o_ref):
    """o = x @ w + b on one row tile.  x:(TM,K)  w:(K,N)  b:(1,N)  o:(TM,N)."""
    x = x_ref[...].astype(jnp.float32)
    w = w_ref[...].astype(jnp.float32)
    acc = jnp.dot(x, w, preferred_element_type=jnp.float32)
    o_ref[...] = (acc + b_ref[...].astype(jnp.float32)).astype(o_ref.dtype)


def _attention_kernel(q_ref, k_ref, v_ref, o_ref, *, scale):
    """Softmax attention for one (batch, head) slice.  q:(1,Lq,Dh)  k,v:(1,Lk,Dh)."""
    q = q_ref[0].astype(jnp.float32)                       # (Lq, Dh)
    k = k_ref[0].astype(jnp.float32)                       # (Lk, Dh)
    v = v_ref[0].astype(jnp.float32)                       # (Lk, Dh)
    # scores = q @ k^T (contract head dim, no in-kernel transpose materialization)
    s = lax.dot_general(q, k, (((1,), (1,)), ((), ())),
                        preferred_element_type=jnp.float32) * scale   # (Lq, Lk)
    m = jnp.max(s, axis=-1, keepdims=True)
    p = jnp.exp(s - m)
    l = jnp.sum(p, axis=-1, keepdims=True)
    ctx = jnp.dot(p, v, preferred_element_type=jnp.float32) / l       # (Lq, Dh)
    o_ref[0] = ctx.astype(o_ref.dtype)


def _out_proj_residual_ln_kernel(ctx_ref, wo_ref, bo_ref, q1_ref, g_ref, b_ref,
                                 o_ref, *, eps):
    """out = LayerNorm(q1 + ctx @ Wo + bo) on one row tile (dropout == identity)."""
    ctx = ctx_ref[...].astype(jnp.float32)
    wo = wo_ref[...].astype(jnp.float32)
    attn_out = jnp.dot(ctx, wo, preferred_element_type=jnp.float32) \
        + bo_ref[...].astype(jnp.float32)
    y = q1_ref[...].astype(jnp.float32) + attn_out          # residual (dropout = id)
    mu = jnp.mean(y, axis=-1, keepdims=True)
    d = y - mu
    var = jnp.mean(d * d, axis=-1, keepdims=True)
    yn = d * jax.lax.rsqrt(var + eps)
    o_ref[...] = (yn * g_ref[...].astype(jnp.float32)
                  + b_ref[...].astype(jnp.float32)).astype(o_ref.dtype)


# --------------------------------------------------------------------------- wrappers

def _row_tiling(M, tile_m):
    """Pick a row-tile size; pad row count so it divides evenly."""
    if M <= tile_m:
        return M, 0
    pad = (-M) % tile_m
    return tile_m, pad


def pallas_linear(x, w, b, *, tile_m=512):
    """x:(M,K) @ w:(K,N) + b:(N,)  with a grid over row tiles."""
    M, K = x.shape
    N = w.shape[1]
    tm, pad = _row_tiling(M, tile_m)
    if pad:
        x = jnp.pad(x, ((0, pad), (0, 0)))
    Mp = M + pad
    out = pl.pallas_call(
        _linear_kernel,
        out_shape=jax.ShapeDtypeStruct((Mp, N), x.dtype),
        grid=(Mp // tm,),
        in_specs=[
            pl.BlockSpec((tm, K), lambda i: (i, 0)),
            pl.BlockSpec((K, N), lambda i: (0, 0)),
            pl.BlockSpec((1, N), lambda i: (0, 0)),
        ],
        out_specs=pl.BlockSpec((tm, N), lambda i: (i, 0)),
        compiler_params=pltpu.CompilerParams(dimension_semantics=("parallel",)),
    )(x, w, b.reshape(1, N))
    return out[:M] if pad else out


def pallas_mha_core(qh, kh, vh, *, scale):
    """qh:(B*H,Lq,Dh)  kh,vh:(B*H,Lk,Dh)  ->  (B*H,Lq,Dh)."""
    BH, Lq, Dh = qh.shape
    Lk = kh.shape[1]
    return pl.pallas_call(
        functools.partial(_attention_kernel, scale=scale),
        out_shape=jax.ShapeDtypeStruct((BH, Lq, Dh), qh.dtype),
        grid=(BH,),
        in_specs=[
            pl.BlockSpec((1, Lq, Dh), lambda i: (i, 0, 0)),
            pl.BlockSpec((1, Lk, Dh), lambda i: (i, 0, 0)),
            pl.BlockSpec((1, Lk, Dh), lambda i: (i, 0, 0)),
        ],
        out_specs=pl.BlockSpec((1, Lq, Dh), lambda i: (i, 0, 0)),
        compiler_params=pltpu.CompilerParams(dimension_semantics=("parallel",)),
    )(qh, kh, vh)


def pallas_out_proj_residual_ln(ctx, wo, bo, q1, gamma, beta, *, eps=1e-5, tile_m=512):
    """out = LayerNorm(q1 + ctx @ wo + bo).  ctx,q1:(M,E)  wo:(E,E)."""
    M, E = ctx.shape
    tm, pad = _row_tiling(M, tile_m)
    if pad:
        ctx = jnp.pad(ctx, ((0, pad), (0, 0)))
        q1 = jnp.pad(q1, ((0, pad), (0, 0)))
    Mp = M + pad
    out = pl.pallas_call(
        functools.partial(_out_proj_residual_ln_kernel, eps=eps),
        out_shape=jax.ShapeDtypeStruct((Mp, E), ctx.dtype),
        grid=(Mp // tm,),
        in_specs=[
            pl.BlockSpec((tm, E), lambda i: (i, 0)),
            pl.BlockSpec((E, E), lambda i: (0, 0)),
            pl.BlockSpec((1, E), lambda i: (0, 0)),
            pl.BlockSpec((tm, E), lambda i: (i, 0)),
            pl.BlockSpec((1, E), lambda i: (0, 0)),
            pl.BlockSpec((1, E), lambda i: (0, 0)),
        ],
        out_specs=pl.BlockSpec((tm, E), lambda i: (i, 0)),
        compiler_params=pltpu.CompilerParams(dimension_semantics=("parallel",)),
    )(ctx, wo, bo.reshape(1, E), q1, gamma.reshape(1, E), beta.reshape(1, E))
    return out[:M] if pad else out


def cross_attention_forward(params, query, key, value, attention_mask=None,
                            *, num_heads):
    """Pallas implementation of CrossAttentionLayer.forward (eval mode)."""
    if attention_mask is not None:
        # TODO(synk): plumb additive/boolean attn_mask into the attention kernel.
        raise NotImplementedError("attention_mask is not supported in this kernel")

    B, Lq, Dq = query.shape
    Lk = key.shape[1]
    E = params["Wqp"].shape[0]
    H = num_heads
    Dh = E // H

    # Weight layout prep / folding (plain-JAX parameter glue, done once).
    Wqp_t = params["Wqp"].T                                   # (Dq, E)
    Wq_in_t = params["Wq_in"].T                               # (E, E)
    Wk_fold = params["Wkp"].T @ params["Wk_in"].T             # key_proj ∘ in_proj_k
    bk_fold = params["bkp"] @ params["Wk_in"].T + params["bk_in"]
    Wv_fold = params["Wvp"].T @ params["Wv_in"].T             # value_proj ∘ in_proj_v
    bv_fold = params["bvp"] @ params["Wv_in"].T + params["bv_in"]

    q_flat = query.reshape(B * Lq, Dq)
    k_flat = key.reshape(B * Lk, E)
    v_flat = value.reshape(B * Lk, E)

    # Projections (Pallas linear kernels).
    q1 = pallas_linear(q_flat, Wqp_t, params["bqp"])          # (B*Lq, E)  kept for residual
    q2 = pallas_linear(q1, Wq_in_t, params["bq_in"])          # (B*Lq, E)
    k2 = pallas_linear(k_flat, Wk_fold, bk_fold)              # (B*Lk, E)
    v2 = pallas_linear(v_flat, Wv_fold, bv_fold)              # (B*Lk, E)

    # Split heads: (B, L, E) -> (B*H, L, Dh)   (layout glue in the wrapper).
    qh = q2.reshape(B, Lq, H, Dh).transpose(0, 2, 1, 3).reshape(B * H, Lq, Dh)
    kh = k2.reshape(B, Lk, H, Dh).transpose(0, 2, 1, 3).reshape(B * H, Lk, Dh)
    vh = v2.reshape(B, Lk, H, Dh).transpose(0, 2, 1, 3).reshape(B * H, Lk, Dh)

    ctx = pallas_mha_core(qh, kh, vh, scale=1.0 / math.sqrt(Dh))
    ctx = ctx.reshape(B, H, Lq, Dh).transpose(0, 2, 1, 3).reshape(B * Lq, E)

    # Fused out-projection + residual + LayerNorm.
    # TODO(synk): training-mode dropout (on attn weights and attn output) not implemented.
    out = pallas_out_proj_residual_ln(ctx, params["Wo"].T, params["bo"], q1,
                                      params["ln_g"], params["ln_b"], eps=1e-5)
    return out.reshape(B, Lq, E)


# --------------------------------------------------------------------------- reference

def reference_forward(params, query, key, value, *, num_heads, eps=1e-5):
    q1 = query @ params["Wqp"].T + params["bqp"]
    k1 = key @ params["Wkp"].T + params["bkp"]
    v1 = value @ params["Wvp"].T + params["bvp"]
    q2 = q1 @ params["Wq_in"].T + params["bq_in"]
    k2 = k1 @ params["Wk_in"].T + params["bk_in"]
    v2 = v1 @ params["Wv_in"].T + params["bv_in"]
    B, Lq, E = q2.shape
    Lk = k2.shape[1]
    H = num_heads
    Dh = E // H
    qh = q2.reshape(B, Lq, H, Dh).transpose(0, 2, 1, 3)
    kh = k2.reshape(B, Lk, H, Dh).transpose(0, 2, 1, 3)
    vh = v2.reshape(B, Lk, H, Dh).transpose(0, 2, 1, 3)
    s = jnp.einsum("bhqd,bhkd->bhqk", qh, kh) / math.sqrt(Dh)
    a = jax.nn.softmax(s, axis=-1)
    ctx = jnp.einsum("bhqk,bhkd->bhqd", a, vh)
    ctx = ctx.transpose(0, 2, 1, 3).reshape(B, Lq, E)
    attn_out = ctx @ params["Wo"].T + params["bo"]
    y = q1 + attn_out
    mu = y.mean(-1, keepdims=True)
    var = ((y - mu) ** 2).mean(-1, keepdims=True)
    return (y - mu) / jnp.sqrt(var + eps) * params["ln_g"] + params["ln_b"]


# --------------------------------------------------------------------------- demo

if __name__ == "__main__":
    jax.config.update("jax_default_matmul_precision", "highest")

    B, LQ, LK = 2, 8, 8
    QUERY_DIM, EMBED_DIM, NUM_HEADS = 16, 32, 4

    key0 = jax.random.PRNGKey(0)
    ks = jax.random.split(key0, 20)

    def nrm(k, shape, scale=0.2):
        return scale * jax.random.normal(k, shape, dtype=jnp.float32)

    params = dict(
        Wqp=nrm(ks[0], (EMBED_DIM, QUERY_DIM)), bqp=nrm(ks[1], (EMBED_DIM,)),
        Wkp=nrm(ks[2], (EMBED_DIM, EMBED_DIM)), bkp=nrm(ks[3], (EMBED_DIM,)),
        Wvp=nrm(ks[4], (EMBED_DIM, EMBED_DIM)), bvp=nrm(ks[5], (EMBED_DIM,)),
        Wq_in=nrm(ks[6], (EMBED_DIM, EMBED_DIM)), bq_in=nrm(ks[7], (EMBED_DIM,)),
        Wk_in=nrm(ks[8], (EMBED_DIM, EMBED_DIM)), bk_in=nrm(ks[9], (EMBED_DIM,)),
        Wv_in=nrm(ks[10], (EMBED_DIM, EMBED_DIM)), bv_in=nrm(ks[11], (EMBED_DIM,)),
        Wo=nrm(ks[12], (EMBED_DIM, EMBED_DIM)), bo=nrm(ks[13], (EMBED_DIM,)),
        ln_g=1.0 + nrm(ks[14], (EMBED_DIM,), 0.1),
        ln_b=nrm(ks[15], (EMBED_DIM,), 0.1),
    )

    query = nrm(ks[16], (B, LQ, QUERY_DIM), 1.0)
    key_in = nrm(ks[17], (B, LK, EMBED_DIM), 1.0)
    value = nrm(ks[18], (B, LK, EMBED_DIM), 1.0)

    out = cross_attention_forward(params, query, key_in, value,
                                  attention_mask=None, num_heads=NUM_HEADS)
    out = jax.block_until_ready(out)

    ref = reference_forward(params, query, key_in, value, num_heads=NUM_HEADS)
    ref = jax.block_until_ready(ref)

    assert out.shape == (B, LQ, EMBED_DIM), out.shape
    assert jnp.all(jnp.isfinite(out)), "non-finite output"
    max_err = jnp.max(jnp.abs(out - ref))
    assert max_err < 1e-3, f"mismatch vs reference: max abs err = {max_err}"

    print("KERNEL_OK")
</pallas_src>

<mosaic_0001>
module attributes {stable_mosaic.version = 11 : i64} {
  func.func @_linear_kernel(%arg0: i32, %arg1: memref<16x16xf32, #tpu.memory_space<vmem>>, %arg2: memref<16x32xf32, #tpu.memory_space<vmem>>, %arg3: memref<1x32xf32, #tpu.memory_space<vmem>>, %arg4: memref<16x32xf32, #tpu.memory_space<vmem>>) attributes {dimension_semantics = [#tpu.dimension_semantics<parallel>], iteration_bounds = array<i64: 1>, scalar_prefetch = 0 : i64, scratch_operands = 0 : i64, tpu.core_type = #tpu.core_type<tc>, window_params = [{transform_indices = @transform_0, window_bounds = array<i64: 16, 16>}, {pipeline_mode = #tpu.pipeline_mode<synchronous>, transform_indices = @transform_1, window_bounds = array<i64: 16, 32>}, {pipeline_mode = #tpu.pipeline_mode<synchronous>, transform_indices = @transform_2, window_bounds = array<i64: 1, 32>}, {transform_indices = @transform_3, window_bounds = array<i64: 16, 32>}]} {
    %c0 = arith.constant 0 : index
    %c0_0 = arith.constant 0 : index
    %0 = vector.load %arg1[%c0, %c0_0] : memref<16x16xf32, #tpu.memory_space<vmem>>, vector<16x16xf32>
    %c0_1 = arith.constant 0 : index
    %c0_2 = arith.constant 0 : index
    %1 = vector.load %arg2[%c0_1, %c0_2] : memref<16x32xf32, #tpu.memory_space<vmem>>, vector<16x32xf32>
    %cst = arith.constant dense<0.000000e+00> : vector<16x32xf32>
    %2 = tpu.matmul %0, %1, %cst {dimension_numbers = #tpu.dot_dimension_numbers<[1], [0], [0], [1], [0, 0, 1, 1], [], []>, precision = #tpu.contract_precision<fp32>} : vector<16x16xf32>, vector<16x32xf32>, vector<16x32xf32> -> vector<16x32xf32>
    %c0_3 = arith.constant 0 : index
    %c0_4 = arith.constant 0 : index
    %3 = vector.load %arg3[%c0_3, %c0_4] : memref<1x32xf32, #tpu.memory_space<vmem>>, vector<1x32xf32>
    %4 = vector.broadcast %3 : vector<1x32xf32> to vector<16x32xf32>
    %5 = arith.addf %2, %4 : vector<16x32xf32>
    %c0_5 = arith.constant 0 : index
    %c0_6 = arith.constant 0 : index
    %6 = vector.load %arg4[%c0_5, %c0_6] : memref<16x32xf32, #tpu.memory_space<vmem>>, vector<16x32xf32>
    tpu.vector_store %arg4[%c0_5, %c0_6], %5 {strides = array<i32>} : memref<16x32xf32, #tpu.memory_space<vmem>>, vector<16x32xf32>,
    return
  }
  func.func @transform_0(%arg0: i32) -> (i32, i32) {
    %c0_i32 = arith.constant 0 : i32
    %c0_i32_0 = arith.constant 0 : i32
    return %arg0, %c0_i32 : i32, i32
  }
  func.func @transform_1(%arg0: i32) -> (i32, i32) {
    %c0_i32 = arith.constant 0 : i32
    %c0_i32_0 = arith.constant 0 : i32
    %c0_i32_1 = arith.constant 0 : i32
    return %c0_i32, %c0_i32_0 : i32, i32
  }
  func.func @transform_2(%arg0: i32) -> (i32, i32) {
    %c0_i32 = arith.constant 0 : i32
    %c0_i32_0 = arith.constant 0 : i32
    %c0_i32_1 = arith.constant 0 : i32
    return %c0_i32, %c0_i32_0 : i32, i32
  }
  func.func @transform_3(%arg0: i32) -> (i32, i32) {
    %c0_i32 = arith.constant 0 : i32
    %c0_i32_0 = arith.constant 0 : i32
    return %arg0, %c0_i32 : i32, i32
  }
}

</mosaic_0001>

<bundles_post_ra>
// kernel: tpu_custom_call.1
= control target key start
LH: loop header
LB: loop body
LE: loop exit
PB: predicated region body
PF: predicated region fallthrough
CT: control target
= control target key end

     0   :  { %8 = vsyncpa [#allocation3], 0  ;;  %s837_s0 = inlined_call_operand.hbm [shape: f32[16,16], index: 0, kind: input, shape index: {}]   ;;  %s838_s1 = inlined_call_operand.hbm [shape: f32[16,32], index: 1, kind: input, shape index: {}]   ;;  %s839_s2 = inlined_call_operand.vmem [shape: f32[1,32], index: 2, kind: input, shape index: {}]   ;;  %s840_s3 = inlined_call_operand.hbm [shape: f32[16,32], index: 3, kind: output, shape index: {}]  }
   0x1   :  { %9 = vsyncpa [#allocation6], 0 }
   0x2   :  { %10 = vsyncpa [#allocation4], 0  ;;  %s764_s12 = smov [#allocation2]   ;;  %s692_s16 = scalar_lea.hbm %s837_s0, 256 }
   0x3   :  { %s16_s13 = sshll.u32 %s764_s12, 4  ;;  %p693_p0 = scmp.ne.s32.totalorder %s837_s0, %s692_s16  ;;  %s17_s13 = int_to_ptr.vmem [resolvable:$true] %s16_s13 }
   0x4   :  { %p696_p1 = scmp.lt.u32.totalorder %s692_s16, %s837_s0 }
   0x6   :  { %p698_p2 = pnand %p696_p1, %p693_p0 }
   0x8   :  { %701 = shalt.err (!%p698_p2)
}
   0x9   :  { %s702_s21 = scalar_lea.vmem %s17_s13, 256  ;;  %p707_p4 = scmp.lt.s32.totalorder %s17_s13, %s17_s13 }
   0xa   :  { %p703_p3 = scmp.ne.s32.totalorder %s17_s13, %s702_s21  ;;  %p708_p5 = scmp.lt.s32.totalorder %s702_s21, %s702_s21 }
   0xc   :  { %p709_p6 = por %p708_p5, %p707_p4 }
   0xe   :  { %p710_p7 = pnand %p709_p6, %p703_p3 }
  0x10   :  { %713 = shalt.err (!%p710_p7)
}
  0x11   :  { %s765_s22 = smov 128   ;;  %s766_s23 = smov 8  }
  0x12   :  { %22 = dma.hbm_to_vmem [thread:$0]  %s837_s0, 256, %s17_s13, [#allocation3], %s765_s22, %s765_s22, %s766_s23  }
  0x13   :  { %s767_s26 = smov [#allocation5]   ;;  %s714_s30 = scalar_lea.hbm %s838_s1, 256 }
  0x14   :  { %s28_s27 = sshll.u32 %s767_s26, 4  ;;  %p715_p8 = scmp.ne.s32.totalorder %s838_s1, %s714_s30  ;;  %s29_s27 = int_to_ptr.vmem [resolvable:$true] %s28_s27 }
  0x15   :  { %p718_p9 = scmp.lt.u32.totalorder %s714_s30, %s838_s1 }
  0x17   :  { %p720_p10 = pnand %p718_p9, %p715_p8 }
  0x19   :  { %723 = shalt.err (!%p720_p10)
}
  0x1a   :  { %s724_s8 = scalar_lea.vmem %s29_s27, 256  ;;  %p729_p12 = scmp.lt.s32.totalorder %s29_s27, %s29_s27 }
  0x1b   :  { %p725_p11 = scmp.ne.s32.totalorder %s29_s27, %s724_s8  ;;  %p730_p13 = scmp.lt.s32.totalorder %s724_s8, %s724_s8 }
  0x1d   :  { %p731_p0 = por %p730_p13, %p729_p12 }
  0x1f   :  { %p732_p1 = pnand %p731_p0, %p725_p11 }
  0x21   :  { %735 = shalt.err (!%p732_p1)
}
  0x22   :  { %34 = dma.hbm_to_vmem [thread:$0]  %s838_s1, 256, %s29_s27, [#allocation6], %s765_s22, %s765_s22, %s766_s23  }
  0x23   :  { %758 = dma.done.wait [#allocation3], 256  }
  0x24   :  { %759 = vsyncadd [#allocation3], 4294967040 }
  0x25   :  { %760 = dma.done.wait [#allocation6], 256  }
  0x26   :  { %761 = vsyncadd [#allocation6], 4294967040  ;;  %vm54_vm0 = vcmask 130048   ;;  %v45_v0 = vld [vmem:[#allocation5] sm:$0xff]  ;;  %v46_v1 = vld [vmem:[#allocation5 + $0x8] sm:$0xff]  ;;  %s768_s11 = smov [#allocation7]  }
  0x27   :  { %v43_v2 = vld [vmem:[#allocation2] sm:$0xff]  ;;  %v62_v3 = vand.u32 4294901760, %v45_v0  ;;  %v65_v4 = vand.u32 4294901760, %v46_v1  ;;  %v44_v5 = vld [vmem:[#allocation2 + $0x8] sm:$0xff]  ;;  %s571_s12 = sshll.u32 %s768_s11, 4  ;;  %vm563_vm1 = vcmask 261120   ;;  %s572_s12 = int_to_ptr.vmem [resolvable:$true] %s571_s12 }
  0x28   :  { %v56_v6 = vsel %vm54_vm0, %v43_v2, 0  ;;  %v59_v7 = vsel %vm54_vm0, %v44_v5, 0  ;;  %v584_v32 = vld [vmem:[%s839_s2] ss:$0 sm:$0xff]  ;;  %s736_s13 = scalar_lea.vmem %s572_s12, 256  ;;  %p741_p3 = scmp.lt.s32.totalorder %s572_s12, %s572_s12 }
  0x29   :  { %v128_v8 = vand.u32 4294901760, %v56_v6  ;;  %v651_v9 = vpack.c.bf16 %v65_v4, %v62_v3  ;;  %v138_v10 = vand.u32 4294901760, %v59_v7  ;;  %v150_v11 = vsub.f32 %v45_v0, %v62_v3  ;;  %p737_p2 = scmp.ne.s32.totalorder %s572_s12, %s736_s13  ;;  %p742_p4 = scmp.lt.s32.totalorder %s736_s13, %s736_s13 }
  0x2a   :  { %v157_v12 = vsub.f32 %v46_v1, %v65_v4 }
  0x2b   :  { %v129_v13 = vsub.f32 %v56_v6, %v128_v8  ;;  %664 = vmatprep.subr.bf16.mxu0 %v651_v9  ;;  %652 = vmatprep.subr.bf16.mxu1 %v651_v9  ;;  %v139_v14 = vsub.f32 %v59_v7, %v138_v10  ;;  %v151_v15 = vand.u32 4294901760, %v150_v11  ;;  %p743_p5 = por %p742_p4, %p741_p3 }
  0x2c   :  { %v158_v16 = vand.u32 4294901760, %v157_v12  ;;  %666 = vmatpush3.bf16.msra.mxu0 %v651_v9  ;;  %654 = vmatpush3.bf16.msra.mxu1 %v651_v9  ;;  %v659_v29 = vpack.c.bf16 %v157_v12, %v150_v11 }
  0x2d   :  { %v130_v17 = vand.u32 4294901760, %v129_v13  ;;  %v140_v18 = vand.u32 4294901760, %v139_v14  ;;  %v152_v19 = vsub.f32 %v150_v11, %v151_v15  ;;  %p744_p6 = pnand %p743_p5, %p737_p2 }
  0x2e   :  { %v159_v20 = vsub.f32 %v157_v12, %v158_v16  ;;  %v667_v21 = vpack.c.bf16 %v158_v16, %v151_v15 }
  0x2f   :  { %634 = vmatprep.mubr.f32.mxu0 %v130_v17  ;;  %v131_v22 = vsub.f32 %v129_v13, %v130_v17  ;;  %v141_v23 = vsub.f32 %v139_v14, %v140_v18  ;;  %v153_v24 = vand.u32 4294901760, %v152_v19 }
  0x30   :  { %635 = vmatmul.mubr.f32.vlgmr.msra.gmra.mrb[0].mxu0 %v140_v18  ;;  %v160_v25 = vand.u32 4294901760, %v159_v20  ;;  %668 = vmatprep.subr.bf16.mxu0 %v667_v21 }
  0x31   :  { %v132_v26 = vand.u32 4294901760, %v131_v22  ;;  %670 = vmatpush3.bf16.msra.mxu0 %v667_v21  ;;  %641 = vmatprep.mubr.f32.mxu0 %v128_v8  ;;  %v142_v27 = vand.u32 4294901760, %v141_v23 }
  0x32   :  { %v655_v28 = vpack.c.bf16 %v160_v25, %v153_v24  ;;  %672 = vmatprep.subr.bf16.mxu0 %v651_v9 }
  0x33   :  { %613 = vmatprep.mubr.f32.mxu1 %v132_v26 }
  0x34   :  { %614 = vmatmul.mubr.f32.vlgmr.msra.gmra.mrb[0].mxu1 %v142_v27  ;;  %656 = vmatprep.subr.bf16.mxu1 %v655_v28 }
  0x35   :  { %658 = vmatpush3.bf16.msra.mxu1 %v655_v28  ;;  %620 = vmatprep.mubr.f32.mxu1 %v128_v8 }
  0x36   :  { %660 = vmatprep.subr.bf16.mxu1 %v659_v29 }
  0x38   :  { %642 = vmatmul.mubr.f32.vlgmr.msra.gmra.mrb[0].mxu0 %v138_v10 }
  0x39   :  { %674 = vmatpush3.bf16.msra.mxu0 %v651_v9  ;;  %648 = vmatprep.mubr.f32.mxu0 %v128_v8 }
  0x3c   :  { %621 = vmatmul.mubr.f32.vlgmr.msra.gmra.mrb[0].mxu1 %v138_v10 }
  0x3d   :  { %662 = vmatpush3.bf16.msra.mxu1 %v659_v29  ;;  %627 = vmatprep.mubr.f32.mxu1 %v129_v13 }
  0x40   :  { %649 = vmatmul.mubr.f32.vlgmr.msra.gmra.mrb[0].mxu0 %v138_v10 }
  0x44   :  { %628 = vmatmul.mubr.f32.vlgmr.msra.gmra.mrb[0].mxu1 %v139_v14 }
 0x113   :  { %v650_v30 = vpop.f32.mrb[0].mxu0 }
 0x114   :  { %v553_v31 = vpop.f32.mrb[1].mxu0 }
 0x117   :  { %v629_v33 = vpop.f32.mrb[0].mxu1 }
 0x118   :  { %v675_v34 = vadd.f32 %v629_v33, %v584_v32  ;;  %v307_v35 = vpop.f32.mrb[1].mxu1 }
 0x119   :  { %v677_v36 = vadd.f32 %v584_v32, %v307_v35 }
 0x11a   :  { %v676_v37 = vadd.f32 %v675_v34, %v650_v30 }
 0x11b   :  { %v678_v38 = vadd.f32 %v677_v36, %v553_v31 }
 0x11c   :  { %565 = vst.msk [vmem:[#allocation7 + $0x8] sm:$0xff] %vm563_vm1, %v676_v37 }
 0x11d   :  { %564 = vst.msk [vmem:[#allocation7] sm:$0xff] %vm563_vm1, %v678_v38 }
 0x11e   :  { %747 = shalt.err (!%p744_p6)
}
 0x11f   :  { %s748_s15 = scalar_lea.hbm %s840_s3, 256 }
 0x120   :  { %p749_p7 = scmp.ne.s32.totalorder %s840_s3, %s748_s15  ;;  %p752_p8 = scmp.lt.u32.totalorder %s748_s15, %s840_s3 }
 0x122   :  { %p754_p9 = pnand %p752_p8, %p749_p7 }
 0x124   :  { %757 = shalt.err (!%p754_p9)
}
 0x125   :  { %577 = dma.vmem_to_hbm [thread:$0]  %s572_s12, 256, %s840_s3, [#allocation4], %s765_s22, %s765_s22, %s766_s23  }
 0x126   :  { %762 = dma.done.wait [#allocation4], 256  }
 0x127   :  { %763 = vsyncadd [#allocation4], 4294967040 }
 0x128   :  { %581 = vsyncpa [#allocation3], 1 }
 0x129   :  { %582 = vsyncpa [#allocation6], 1 }
 0x12a   :  { %583 = vsyncpa [#allocation4], 1 }

</bundles_post_ra>
